<compile_context>
chip_gen: v6e
topology: v6e:2x2x1
jax: 0.10.0
libtpu: 0.0.40
codegen_flags: <defaults>
</compile_context>

<pallas_src>
import functools

import jax
import jax.numpy as jnp
from jax.experimental import pallas as pl
from jax.experimental.pallas import tpu as pltpu


# ---------------------------------------------------------------------------
# exact-GELU helper (erf via Abramowitz & Stegun 7.1.26, |err| < 1.5e-7).
# Only used inside the Pallas kernel (pl.reciprocal needs kernel context).
# ---------------------------------------------------------------------------
def _erf(x):
    a1, a2, a3, a4, a5 = (0.254829592, -0.284496736, 1.421413741,
                          -1.453152027, 1.061405429)
    p = 0.3275911
    s = jnp.where(x >= 0, 1.0, -1.0)
    ax = jnp.abs(x)
    # approx reciprocal runs on the EUP slot (frees VALU slots on the widest
    # elementwise tensor in the kernel); ~2^-12 relative error.
    t = pl.reciprocal(1.0 + p * ax, approx=True)
    poly = ((((a5 * t + a4) * t + a3) * t + a2) * t + a1) * t
    return s * (1.0 - poly * jnp.exp(-ax * ax))


def _gelu_exact(x):
    return 0.5 * x * (1.0 + _erf(x * 0.7071067811865475))


# ---------------------------------------------------------------------------
# Pallas kernel: one (Bt*L, D) slab of rows per grid step.
# ---------------------------------------------------------------------------
def convnext_block_kernel(x_ref, dww_ref, dwb_ref, gamma_ref, beta_ref,
                          w1_ref, b1_ref, w2_ref, b2_ref, o_ref, *, seq_len):
    x = x_ref[...]                              # (R, D) f32 -- also the residual
    R, D = x.shape
    K = dww_ref.shape[0]
    pad = K // 2
    L = seq_len

    # Sequence position of every row (the block is Bt sequences of length L
    # stacked along the sublane axis).
    l_idx = jax.lax.broadcasted_iota(jnp.int32, (R, 1), 0) % L

    # --- depthwise conv1d, groups=D, padding='same' (zero pad) --------------
    # PyTorch Conv1d is cross-correlation: y[l,d] = sum_k w[d,k] * x[l+k-pad, d]
    dww = dww_ref[...]                          # (K, D) taps, channel on lanes
    y = jnp.zeros_like(x)
    for k in range(K):                          # static unroll, K = 7
        s = k - pad                             # this tap reads x[l + s]
        if s == 0:
            tap = x
        else:
            # XLU sublane rotate; rows that wrapped past a sequence boundary
            # (including across batch elements) are zeroed by the mask.
            shifted = pltpu.roll(x, shift=(-s) % R, axis=0)
            if s > 0:
                valid = l_idx < (L - s)
            else:
                valid = l_idx >= (-s)
            tap = jnp.where(valid, shifted, 0.0)
        y = y + tap * dww[k:k + 1, :]
    y = y + dwb_ref[...]                        # conv bias, added once at the end

    # --- LayerNorm over channels (eps=1e-5, biased variance), fused moments --
    inv_d = 1.0 / D
    s1 = jnp.sum(y, axis=-1, keepdims=True)
    s2 = jnp.sum(y * y, axis=-1, keepdims=True)
    mean = s1 * inv_d
    var = jnp.maximum(s2 * inv_d - mean * mean, 0.0)
    yn = (y - mean) * jax.lax.rsqrt(var + 1e-5)
    yn = yn * gamma_ref[...] + beta_ref[...]

    # --- pointwise MLP: Linear -> GELU -> Linear (bf16 MXU, f32 accumulate) --
    h = jnp.dot(yn.astype(jnp.bfloat16), w1_ref[...],
                preferred_element_type=jnp.float32) + b1_ref[...]
    h = _gelu_exact(h)
    out = jnp.dot(h.astype(jnp.bfloat16), w2_ref[...],
                  preferred_element_type=jnp.float32) + b2_ref[...]

    # --- residual add --------------------------------------------------------
    o_ref[...] = (x + out).astype(o_ref.dtype)


# ---------------------------------------------------------------------------
# Tile chooser: how many whole sequences per grid step.
# ---------------------------------------------------------------------------
def _choose_batch_tile(B, L, D, H, *, itemsize=4, vmem_budget=24 << 20,
                       target_rows=128):
    """Pick Bt (a divisor of B): Bt*L rows are processed per grid step.

    Prefer the smallest divisor that reaches `target_rows` rows (fills the MXU
    and amortizes the ~0.35 us per-step overhead); otherwise the largest
    divisor whose rough activation working set still fits the VMEM budget.
    Tiles whose sublane count is not a multiple of 8 are skipped unless the
    block covers the whole array.
    """
    divisors = [d for d in range(1, B + 1) if B % d == 0]

    def ok_shape(bt):
        return bt == B or (bt * L) % 8 == 0

    def working_set(bt):
        rows = bt * L
        # double-buffered in/out blocks + hidden activation + temps (upper bound)
        return itemsize * rows * (4 * D + 2 * H)

    fitting = [d for d in divisors if ok_shape(d) and working_set(d) <= vmem_budget]
    if not fitting:
        return 1 if ok_shape(1) else B
    for d in fitting:
        if d * L >= target_rows:
            return d
    return fitting[-1]


# ---------------------------------------------------------------------------
# Wrapper
# ---------------------------------------------------------------------------
@jax.jit
def convnext_block(x, dww, dwb, gamma, beta, w1, b1, w2, b2):
    B, L, D = x.shape
    K = dww.shape[0]
    H = w1.shape[1]

    Bt = _choose_batch_tile(B, L, D, H)
    R = Bt * L                       # rows per grid step (MXU M dimension)
    grid = (B // Bt,)

    x2 = x.reshape(B * L, D)         # contiguous row-major reshape: free
    w1b = w1.astype(jnp.bfloat16)    # MXU is natively bf16 on v5e/v6e/v7x
    w2b = w2.astype(jnp.bfloat16)

    inv = lambda i: (0, 0)           # grid-invariant parameter blocks

    cost = pl.CostEstimate(
        flops=4 * B * L * D * H + 2 * B * L * D * K,
        transcendentals=2 * B * L * H,                 # exp + approx reciprocal
        bytes_accessed=(4 * 2 * B * L * D              # x in + out (f32)
                        + 2 * 2 * D * H                # bf16 w1 + w2
                        + 4 * (K * D + 3 * D + H)))    # small params

    out_flat = pl.pallas_call(
        functools.partial(convnext_block_kernel, seq_len=L),
        out_shape=jax.ShapeDtypeStruct((B * L, D), x.dtype),
        grid=grid,
        in_specs=[
            pl.BlockSpec((R, D), lambda i: (i, 0)),    # x rows
            pl.BlockSpec((K, D), inv),                 # dw conv weight (K, D)
            pl.BlockSpec((1, D), inv),                 # dw conv bias
            pl.BlockSpec((1, D), inv),                 # LN gamma
            pl.BlockSpec((1, D), inv),                 # LN beta
            pl.BlockSpec((D, H), inv),                 # pw_conv1 weight (D, 2D), bf16
            pl.BlockSpec((1, H), inv),                 # pw_conv1 bias
            pl.BlockSpec((H, D), inv),                 # pw_conv2 weight (2D, D), bf16
            pl.BlockSpec((1, D), inv),                 # pw_conv2 bias
        ],
        out_specs=pl.BlockSpec((R, D), lambda i: (i, 0)),
        compiler_params=pltpu.CompilerParams(
            dimension_semantics=("parallel",),         # megacore-shardable on v7x
            vmem_limit_bytes=48 * 1024 * 1024),        # headroom under v7x's 64 MiB
        cost_estimate=cost,
    )(x2, dww, dwb, gamma, beta, w1b, b1, w2b, b2)
    # TODO(synk): for production sequence lengths add an L-tile grid axis with a
    # (K-1)-row halo so the per-step working set stays bounded on v7x (64 MiB VMEM).
    return out_flat.reshape(B, L, D)


# ---------------------------------------------------------------------------
# Pure-JAX reference (PyTorch semantics). matmul_dtype=bf16 mimics the kernel's
# MXU input precision for a tight comparison.
# ---------------------------------------------------------------------------
def convnext_block_ref(x, dww, dwb, gamma, beta, w1, b1, w2, b2,
                       matmul_dtype=jnp.float32):
    B, L, D = x.shape
    K = dww.shape[0]
    pad = K // 2
    xp = jnp.pad(x, ((0, 0), (pad, pad), (0, 0)))
    y = jnp.zeros_like(x)
    for k in range(K):
        y = y + xp[:, k:k + L, :] * dww[k][None, None, :]
    y = y + dwb
    mean = jnp.mean(y, axis=-1, keepdims=True)
    var = jnp.mean((y - mean) ** 2, axis=-1, keepdims=True)
    yn = (y - mean) * jax.lax.rsqrt(var + 1e-5) * gamma + beta
    h = jnp.dot(yn.astype(matmul_dtype), w1.astype(matmul_dtype),
                preferred_element_type=jnp.float32) + b1
    h = jax.nn.gelu(h, approximate=False)
    out = jnp.dot(h.astype(matmul_dtype), w2.astype(matmul_dtype),
                  preferred_element_type=jnp.float32) + b2
    return x + out


# ---------------------------------------------------------------------------
if __name__ == "__main__":
    # Module config: d_model=32, kernel_size=7, expand_ratio=2
    B, L, D = 2, 16, 32
    K = 7
    H = D * 2

    key = jax.random.PRNGKey(0)
    ks = jax.random.split(key, 8)
    f32 = jnp.float32

    x = jax.random.normal(ks[0], (B, L, D), dtype=f32)

    # Deterministic synthetic parameters (PyTorch shapes, re-laid-out):
    #   Conv1d weight (D, 1, K)  -> stored as (K, D)
    #   Linear1 weight (2D, D)   -> stored transposed as (D, 2D)
    #   Linear2 weight (D, 2D)   -> stored transposed as (2D, D)
    dww = jax.random.normal(ks[1], (K, D), dtype=f32) * 0.1
    dwb = jax.random.normal(ks[2], (1, D), dtype=f32) * 0.1
    gamma = jnp.ones((1, D), f32) + 0.05 * jax.random.normal(ks[3], (1, D), dtype=f32)
    beta = 0.05 * jax.random.normal(ks[4], (1, D), dtype=f32)
    w1 = jax.random.normal(ks[5], (D, H), dtype=f32) * (1.0 / jnp.sqrt(D))
    b1 = jax.random.normal(ks[6], (1, H), dtype=f32) * 0.05
    w2 = jax.random.normal(ks[7], (H, D), dtype=f32) * (1.0 / jnp.sqrt(H))
    b2 = jnp.zeros((1, D), dtype=f32)

    out = convnext_block(x, dww, dwb, gamma, beta, w1, b1, w2, b2)
    out = jax.block_until_ready(out)
    assert out.shape == (B, L, D)

    # 1) Same-precision reference (bf16 MXU inputs, f32 accumulate): tight check.
    ref_bf16 = convnext_block_ref(x, dww, dwb, gamma, beta, w1, b1, w2, b2,
                                  matmul_dtype=jnp.bfloat16)
    err_b = float(jnp.max(jnp.abs(out - ref_bf16)))
    assert jnp.allclose(out, ref_bf16, rtol=1e-2, atol=1e-2), \
        f"max abs err vs bf16-matmul reference = {err_b}"

    # 2) Full-f32 PyTorch-semantics reference: loose check (bf16 MXU inputs and
    #    the approx reciprocal in the erf polynomial dominate the deviation).
    ref_f32 = convnext_block_ref(x, dww, dwb, gamma, beta, w1, b1, w2, b2)
    err_f = float(jnp.max(jnp.abs(out - ref_f32)))
    assert jnp.allclose(out, ref_f32, rtol=4e-2, atol=4e-2), \
        f"max abs err vs f32 reference = {err_f}"

    print("KERNEL_OK")
</pallas_src>

<mosaic_0001>
module attributes {stable_mosaic.version = 11 : i64} {
  func.func @convnext_block_kernel(%arg0: i32, %arg1: memref<32x32xf32, #tpu.memory_space<vmem>>, %arg2: memref<7x32xf32, #tpu.memory_space<vmem>>, %arg3: memref<1x32xf32, #tpu.memory_space<vmem>>, %arg4: memref<1x32xf32, #tpu.memory_space<vmem>>, %arg5: memref<1x32xf32, #tpu.memory_space<vmem>>, %arg6: memref<32x64xbf16, #tpu.memory_space<vmem>>, %arg7: memref<1x64xf32, #tpu.memory_space<vmem>>, %arg8: memref<64x32xbf16, #tpu.memory_space<vmem>>, %arg9: memref<1x32xf32, #tpu.memory_space<vmem>>, %arg10: memref<32x32xf32, #tpu.memory_space<vmem>>) attributes {dimension_semantics = [#tpu.dimension_semantics<parallel>], iteration_bounds = array<i64: 1>, scalar_prefetch = 0 : i64, scratch_operands = 0 : i64, tpu.core_type = #tpu.core_type<tc>, window_params = [{transform_indices = @transform_0, window_bounds = array<i64: 32, 32>}, {pipeline_mode = #tpu.pipeline_mode<synchronous>, transform_indices = @transform_1, window_bounds = array<i64: 7, 32>}, {pipeline_mode = #tpu.pipeline_mode<synchronous>, transform_indices = @transform_2, window_bounds = array<i64: 1, 32>}, {pipeline_mode = #tpu.pipeline_mode<synchronous>, transform_indices = @transform_3, window_bounds = array<i64: 1, 32>}, {pipeline_mode = #tpu.pipeline_mode<synchronous>, transform_indices = @transform_4, window_bounds = array<i64: 1, 32>}, {pipeline_mode = #tpu.pipeline_mode<synchronous>, transform_indices = @transform_5, window_bounds = array<i64: 32, 64>}, {pipeline_mode = #tpu.pipeline_mode<synchronous>, transform_indices = @transform_6, window_bounds = array<i64: 1, 64>}, {pipeline_mode = #tpu.pipeline_mode<synchronous>, transform_indices = @transform_7, window_bounds = array<i64: 64, 32>}, {pipeline_mode = #tpu.pipeline_mode<synchronous>, transform_indices = @transform_8, window_bounds = array<i64: 1, 32>}, {transform_indices = @transform_9, window_bounds = array<i64: 32, 32>}]} {
    %c0 = arith.constant 0 : index
    %c0_0 = arith.constant 0 : index
    %0 = vector.load %arg1[%c0, %c0_0] : memref<32x32xf32, #tpu.memory_space<vmem>>, vector<32x32xf32>
    %1 = tpu.iota {dimensions = array<i32: 0>} : vector<32x1xi32>
    %c16_i32 = arith.constant 16 : i32
    %c0_i32 = arith.constant 0 : i32
    %2 = arith.cmpi eq, %c16_i32, %c0_i32 : i32
    %c1_i32 = arith.constant 1 : i32
    %3 = arith.select %2, %c1_i32, %c16_i32 : i32
    %4 = vector.broadcast %3 : i32 to vector<32x1xi32>
    %5 = arith.remsi %1, %4 : vector<32x1xi32>
    %c0_i32_1 = arith.constant 0 : i32
    %6 = vector.broadcast %c0_i32_1 : i32 to vector<32x1xi32>
    %7 = arith.cmpi ne, %5, %6 : vector<32x1xi32>
    %c0_i32_2 = arith.constant 0 : i32
    %8 = vector.broadcast %c0_i32_2 : i32 to vector<32x1xi32>
    %9 = arith.cmpi slt, %5, %8 : vector<32x1xi32>
    %c0_i32_3 = arith.constant 0 : i32
    %10 = arith.cmpi slt, %3, %c0_i32_3 : i32
    %11 = vector.broadcast %10 : i1 to vector<32x1xi1>
    %12 = vector.broadcast %11 : vector<32x1xi1> to vector<32x1xi1>
    %13 = arith.xori %9, %12 : vector<32x1xi1>
    %14 = arith.andi %13, %7 : vector<32x1xi1>
    %15 = vector.broadcast %3 : i32 to vector<32x1xi32>
    %16 = arith.addi %5, %15 : vector<32x1xi32>
    %17 = arith.select %14, %16, %5 : vector<32x1xi1>, vector<32x1xi32>
    %c0_4 = arith.constant 0 : index
    %c0_5 = arith.constant 0 : index
    %18 = vector.load %arg2[%c0_4, %c0_5] : memref<7x32xf32, #tpu.memory_space<vmem>>, vector<7x32xf32>
    %cst = arith.constant 0.000000e+00 : f32
    %19 = vector.broadcast %cst : f32 to vector<32x32xf32>
    %c3_i32 = arith.constant 3 : i32
    %20 = tpu.dynamic_rotate %0 by %c3_i32 dim 0 : vector<32x32xf32>, i32 -> vector<32x32xf32>
    %c3_i32_6 = arith.constant 3 : i32
    %21 = vector.broadcast %c3_i32_6 : i32 to vector<32x1xi32>
    %22 = arith.cmpi sge, %17, %21 : vector<32x1xi32>
    %cst_7 = arith.constant 0.000000e+00 : f32
    %23 = vector.shape_cast %22 : vector<32x1xi1> to vector<32x1xi1>
    %24 = vector.broadcast %23 : vector<32x1xi1> to vector<32x32xi1>
    %25 = vector.broadcast %cst_7 : f32 to vector<32x32xf32>
    %26 = arith.select %24, %20, %25 : vector<32x32xi1>, vector<32x32xf32>
    %27 = vector.extract_strided_slice %18 {offsets = [0, 0], sizes = [1, 32], strides = [1, 1]} : vector<7x32xf32> to vector<1x32xf32>
    %28 = vector.broadcast %27 : vector<1x32xf32> to vector<32x32xf32>
    %29 = arith.mulf %26, %28 : vector<32x32xf32>
    %30 = arith.addf %19, %29 : vector<32x32xf32>
    %c2_i32 = arith.constant 2 : i32
    %31 = tpu.dynamic_rotate %0 by %c2_i32 dim 0 : vector<32x32xf32>, i32 -> vector<32x32xf32>
    %c2_i32_8 = arith.constant 2 : i32
    %32 = vector.broadcast %c2_i32_8 : i32 to vector<32x1xi32>
    %33 = arith.cmpi sge, %17, %32 : vector<32x1xi32>
    %cst_9 = arith.constant 0.000000e+00 : f32
    %34 = vector.shape_cast %33 : vector<32x1xi1> to vector<32x1xi1>
    %35 = vector.broadcast %34 : vector<32x1xi1> to vector<32x32xi1>
    %36 = vector.broadcast %cst_9 : f32 to vector<32x32xf32>
    %37 = arith.select %35, %31, %36 : vector<32x32xi1>, vector<32x32xf32>
    %38 = vector.extract_strided_slice %18 {offsets = [1, 0], sizes = [1, 32], strides = [1, 1]} : vector<7x32xf32> to vector<1x32xf32>
    %39 = vector.broadcast %38 : vector<1x32xf32> to vector<32x32xf32>
    %40 = arith.mulf %37, %39 : vector<32x32xf32>
    %41 = arith.addf %30, %40 : vector<32x32xf32>
    %c1_i32_10 = arith.constant 1 : i32
    %42 = tpu.dynamic_rotate %0 by %c1_i32_10 dim 0 : vector<32x32xf32>, i32 -> vector<32x32xf32>
    %c1_i32_11 = arith.constant 1 : i32
    %43 = vector.broadcast %c1_i32_11 : i32 to vector<32x1xi32>
    %44 = arith.cmpi sge, %17, %43 : vector<32x1xi32>
    %cst_12 = arith.constant 0.000000e+00 : f32
    %45 = vector.shape_cast %44 : vector<32x1xi1> to vector<32x1xi1>
    %46 = vector.broadcast %45 : vector<32x1xi1> to vector<32x32xi1>
    %47 = vector.broadcast %cst_12 : f32 to vector<32x32xf32>
    %48 = arith.select %46, %42, %47 : vector<32x32xi1>, vector<32x32xf32>
    %49 = vector.extract_strided_slice %18 {offsets = [2, 0], sizes = [1, 32], strides = [1, 1]} : vector<7x32xf32> to vector<1x32xf32>
    %50 = vector.broadcast %49 : vector<1x32xf32> to vector<32x32xf32>
    %51 = arith.mulf %48, %50 : vector<32x32xf32>
    %52 = arith.addf %41, %51 : vector<32x32xf32>
    %53 = vector.extract_strided_slice %18 {offsets = [3, 0], sizes = [1, 32], strides = [1, 1]} : vector<7x32xf32> to vector<1x32xf32>
    %54 = vector.broadcast %53 : vector<1x32xf32> to vector<32x32xf32>
    %55 = arith.mulf %0, %54 : vector<32x32xf32>
    %56 = arith.addf %52, %55 : vector<32x32xf32>
    %c31_i32 = arith.constant 31 : i32
    %57 = tpu.dynamic_rotate %0 by %c31_i32 dim 0 : vector<32x32xf32>, i32 -> vector<32x32xf32>
    %c15_i32 = arith.constant 15 : i32
    %58 = vector.broadcast %c15_i32 : i32 to vector<32x1xi32>
    %59 = arith.cmpi slt, %17, %58 : vector<32x1xi32>
    %cst_13 = arith.constant 0.000000e+00 : f32
    %60 = vector.shape_cast %59 : vector<32x1xi1> to vector<32x1xi1>
    %61 = vector.broadcast %60 : vector<32x1xi1> to vector<32x32xi1>
    %62 = vector.broadcast %cst_13 : f32 to vector<32x32xf32>
    %63 = arith.select %61, %57, %62 : vector<32x32xi1>, vector<32x32xf32>
    %64 = vector.extract_strided_slice %18 {offsets = [4, 0], sizes = [1, 32], strides = [1, 1]} : vector<7x32xf32> to vector<1x32xf32>
    %65 = vector.broadcast %64 : vector<1x32xf32> to vector<32x32xf32>
    %66 = arith.mulf %63, %65 : vector<32x32xf32>
    %67 = arith.addf %56, %66 : vector<32x32xf32>
    %c30_i32 = arith.constant 30 : i32
    %68 = tpu.dynamic_rotate %0 by %c30_i32 dim 0 : vector<32x32xf32>, i32 -> vector<32x32xf32>
    %c14_i32 = arith.constant 14 : i32
    %69 = vector.broadcast %c14_i32 : i32 to vector<32x1xi32>
    %70 = arith.cmpi slt, %17, %69 : vector<32x1xi32>
    %cst_14 = arith.constant 0.000000e+00 : f32
    %71 = vector.shape_cast %70 : vector<32x1xi1> to vector<32x1xi1>
    %72 = vector.broadcast %71 : vector<32x1xi1> to vector<32x32xi1>
    %73 = vector.broadcast %cst_14 : f32 to vector<32x32xf32>
    %74 = arith.select %72, %68, %73 : vector<32x32xi1>, vector<32x32xf32>
    %75 = vector.extract_strided_slice %18 {offsets = [5, 0], sizes = [1, 32], strides = [1, 1]} : vector<7x32xf32> to vector<1x32xf32>
    %76 = vector.broadcast %75 : vector<1x32xf32> to vector<32x32xf32>
    %77 = arith.mulf %74, %76 : vector<32x32xf32>
    %78 = arith.addf %67, %77 : vector<32x32xf32>
    %c29_i32 = arith.constant 29 : i32
    %79 = tpu.dynamic_rotate %0 by %c29_i32 dim 0 : vector<32x32xf32>, i32 -> vector<32x32xf32>
    %c13_i32 = arith.constant 13 : i32
    %80 = vector.broadcast %c13_i32 : i32 to vector<32x1xi32>
    %81 = arith.cmpi slt, %17, %80 : vector<32x1xi32>
    %cst_15 = arith.constant 0.000000e+00 : f32
    %82 = vector.shape_cast %81 : vector<32x1xi1> to vector<32x1xi1>
    %83 = vector.broadcast %82 : vector<32x1xi1> to vector<32x32xi1>
    %84 = vector.broadcast %cst_15 : f32 to vector<32x32xf32>
    %85 = arith.select %83, %79, %84 : vector<32x32xi1>, vector<32x32xf32>
    %86 = vector.extract_strided_slice %18 {offsets = [6, 0], sizes = [1, 32], strides = [1, 1]} : vector<7x32xf32> to vector<1x32xf32>
    %87 = vector.broadcast %86 : vector<1x32xf32> to vector<32x32xf32>
    %88 = arith.mulf %85, %87 : vector<32x32xf32>
    %89 = arith.addf %78, %88 : vector<32x32xf32>
    %c0_16 = arith.constant 0 : index
    %c0_17 = arith.constant 0 : index
    %90 = vector.load %arg3[%c0_16, %c0_17] : memref<1x32xf32, #tpu.memory_space<vmem>>, vector<1x32xf32>
    %91 = vector.broadcast %90 : vector<1x32xf32> to vector<32x32xf32>
    %92 = arith.addf %89, %91 : vector<32x32xf32>
    %cst_18 = arith.constant dense<0.000000e+00> : vector<32xf32>
    %93 = vector.multi_reduction <add>, %92, %cst_18 [1] : vector<32x32xf32> to vector<32xf32>
    %94 = vector.shape_cast %93 : vector<32xf32> to vector<32x1xf32>
    %95 = arith.mulf %92, %92 : vector<32x32xf32>
    %cst_19 = arith.constant dense<0.000000e+00> : vector<32xf32>
    %96 = vector.multi_reduction <add>, %95, %cst_19 [1] : vector<32x32xf32> to vector<32xf32>
    %97 = vector.shape_cast %96 : vector<32xf32> to vector<32x1xf32>
    %cst_20 = arith.constant 3.125000e-02 : f32
    %98 = vector.broadcast %cst_20 : f32 to vector<32x1xf32>
    %99 = arith.mulf %94, %98 : vector<32x1xf32>
    %cst_21 = arith.constant 3.125000e-02 : f32
    %100 = vector.broadcast %cst_21 : f32 to vector<32x1xf32>
    %101 = arith.mulf %97, %100 : vector<32x1xf32>
    %102 = arith.mulf %99, %99 : vector<32x1xf32>
    %103 = arith.subf %101, %102 : vector<32x1xf32>
    %cst_22 = arith.constant 0.000000e+00 : f32
    %104 = vector.broadcast %cst_22 : f32 to vector<32x1xf32>
    %105 = arith.maximumf %103, %104 : vector<32x1xf32>
    %106 = vector.broadcast %99 : vector<32x1xf32> to vector<32x32xf32>
    %107 = arith.subf %92, %106 : vector<32x32xf32>
    %cst_23 = arith.constant 9.99999974E-6 : f32
    %108 = vector.broadcast %cst_23 : f32 to vector<32x1xf32>
    %109 = arith.addf %105, %108 : vector<32x1xf32>
    %110 = math.rsqrt %109 : vector<32x1xf32>
    %111 = vector.broadcast %110 : vector<32x1xf32> to vector<32x32xf32>
    %112 = arith.mulf %107, %111 : vector<32x32xf32>
    %c0_24 = arith.constant 0 : index
    %c0_25 = arith.constant 0 : index
    %113 = vector.load %arg4[%c0_24, %c0_25] : memref<1x32xf32, #tpu.memory_space<vmem>>, vector<1x32xf32>
    %114 = vector.broadcast %113 : vector<1x32xf32> to vector<32x32xf32>
    %115 = arith.mulf %112, %114 : vector<32x32xf32>
    %c0_26 = arith.constant 0 : index
    %c0_27 = arith.constant 0 : index
    %116 = vector.load %arg5[%c0_26, %c0_27] : memref<1x32xf32, #tpu.memory_space<vmem>>, vector<1x32xf32>
    %117 = vector.broadcast %116 : vector<1x32xf32> to vector<32x32xf32>
    %118 = arith.addf %115, %117 : vector<32x32xf32>
    %119 = arith.truncf %118 : vector<32x32xf32> to vector<32x32xbf16>
    %c0_28 = arith.constant 0 : index
    %c0_29 = arith.constant 0 : index
    %120 = vector.load %arg6[%c0_28, %c0_29] : memref<32x64xbf16, #tpu.memory_space<vmem>>, vector<32x64xbf16>
    %cst_30 = arith.constant dense<0.000000e+00> : vector<32x64xf32>
    %121 = tpu.matmul %119, %120, %cst_30 {dimension_numbers = #tpu.dot_dimension_numbers<[1], [0], [0], [1], [0, 0, 1, 1], [], []>} : vector<32x32xbf16>, vector<32x64xbf16>, vector<32x64xf32> -> vector<32x64xf32>
    %c0_31 = arith.constant 0 : index
    %c0_32 = arith.constant 0 : index
    %122 = vector.load %arg7[%c0_31, %c0_32] : memref<1x64xf32, #tpu.memory_space<vmem>>, vector<1x64xf32>
    %123 = vector.broadcast %122 : vector<1x64xf32> to vector<32x64xf32>
    %124 = arith.addf %121, %123 : vector<32x64xf32>
    %cst_33 = arith.constant 5.000000e-01 : f32
    %125 = vector.broadcast %cst_33 : f32 to vector<32x64xf32>
    %126 = arith.mulf %125, %124 : vector<32x64xf32>
    %cst_34 = arith.constant 0.707106769 : f32
    %127 = vector.broadcast %cst_34 : f32 to vector<32x64xf32>
    %128 = arith.mulf %124, %127 : vector<32x64xf32>
    %cst_35 = arith.constant 0.000000e+00 : f32
    %129 = vector.broadcast %cst_35 : f32 to vector<32x64xf32>
    %130 = arith.cmpf oge, %128, %129 : vector<32x64xf32>
    %cst_36 = arith.constant 1.000000e+00 : f32
    %cst_37 = arith.constant -1.000000e+00 : f32
    %131 = vector.broadcast %cst_36 : f32 to vector<32x64xf32>
    %132 = vector.broadcast %cst_37 : f32 to vector<32x64xf32>
    %133 = arith.select %130, %131, %132 : vector<32x64xi1>, vector<32x64xf32>
    %134 = math.absf %128 : vector<32x64xf32>
    %cst_38 = arith.constant 0.327591091 : f32
    %135 = vector.broadcast %cst_38 : f32 to vector<32x64xf32>
    %136 = arith.mulf %135, %134 : vector<32x64xf32>
    %cst_39 = arith.constant 1.000000e+00 : f32
    %137 = vector.broadcast %cst_39 : f32 to vector<32x64xf32>
    %138 = arith.addf %137, %136 : vector<32x64xf32>
    %139 = tpu.reciprocal %138 {approx = true} : vector<32x64xf32> -> vector<32x64xf32>
    %cst_40 = arith.constant 1.06140542 : f32
    %140 = vector.broadcast %cst_40 : f32 to vector<32x64xf32>
    %141 = arith.mulf %140, %139 : vector<32x64xf32>
    %cst_41 = arith.constant -1.45315206 : f32
    %142 = vector.broadcast %cst_41 : f32 to vector<32x64xf32>
    %143 = arith.addf %141, %142 : vector<32x64xf32>
    %144 = arith.mulf %143, %139 : vector<32x64xf32>
    %cst_42 = arith.constant 1.42141378 : f32
    %145 = vector.broadcast %cst_42 : f32 to vector<32x64xf32>
    %146 = arith.addf %144, %145 : vector<32x64xf32>
    %147 = arith.mulf %146, %139 : vector<32x64xf32>
    %cst_43 = arith.constant -0.284496725 : f32
    %148 = vector.broadcast %cst_43 : f32 to vector<32x64xf32>
    %149 = arith.addf %147, %148 : vector<32x64xf32>
    %150 = arith.mulf %149, %139 : vector<32x64xf32>
    %cst_44 = arith.constant 0.254829586 : f32
    %151 = vector.broadcast %cst_44 : f32 to vector<32x64xf32>
    %152 = arith.addf %150, %151 : vector<32x64xf32>
    %153 = arith.mulf %152, %139 : vector<32x64xf32>
    %cst_45 = arith.constant 0.000000e+00 : f32
    %154 = vector.broadcast %cst_45 : f32 to vector<32x64xf32>
    %155 = arith.subf %154, %134 : vector<32x64xf32>
    %156 = arith.mulf %155, %134 : vector<32x64xf32>
    %157 = math.exp %156 : vector<32x64xf32>
    %158 = arith.mulf %153, %157 : vector<32x64xf32>
    %cst_46 = arith.constant 1.000000e+00 : f32
    %159 = vector.broadcast %cst_46 : f32 to vector<32x64xf32>
    %160 = arith.subf %159, %158 : vector<32x64xf32>
    %161 = arith.mulf %133, %160 : vector<32x64xf32>
    %cst_47 = arith.constant 1.000000e+00 : f32
    %162 = vector.broadcast %cst_47 : f32 to vector<32x64xf32>
    %163 = arith.addf %162, %161 : vector<32x64xf32>
    %164 = arith.mulf %126, %163 : vector<32x64xf32>
    %165 = arith.truncf %164 : vector<32x64xf32> to vector<32x64xbf16>
    %c0_48 = arith.constant 0 : index
    %c0_49 = arith.constant 0 : index
    %166 = vector.load %arg8[%c0_48, %c0_49] : memref<64x32xbf16, #tpu.memory_space<vmem>>, vector<64x32xbf16>
    %cst_50 = arith.constant dense<0.000000e+00> : vector<32x32xf32>
    %167 = tpu.matmul %165, %166, %cst_50 {dimension_numbers = #tpu.dot_dimension_numbers<[1], [0], [0], [1], [0, 0, 1, 1], [], []>} : vector<32x64xbf16>, vector<64x32xbf16>, vector<32x32xf32> -> vector<32x32xf32>
    %c0_51 = arith.constant 0 : index
    %c0_52 = arith.constant 0 : index
    %168 = vector.load %arg9[%c0_51, %c0_52] : memref<1x32xf32, #tpu.memory_space<vmem>>, vector<1x32xf32>
    %169 = vector.broadcast %168 : vector<1x32xf32> to vector<32x32xf32>
    %170 = arith.addf %167, %169 : vector<32x32xf32>
    %171 = arith.addf %0, %170 : vector<32x32xf32>
    %c0_53 = arith.constant 0 : index
    %c0_54 = arith.constant 0 : index
    %172 = vector.load %arg10[%c0_53, %c0_54] : memref<32x32xf32, #tpu.memory_space<vmem>>, vector<32x32xf32>
    tpu.vector_store %arg10[%c0_53, %c0_54], %171 {strides = array<i32>} : memref<32x32xf32, #tpu.memory_space<vmem>>, vector<32x32xf32>,
    return
  }
  func.func @transform_0(%arg0: i32) -> (i32, i32) {
    %c0_i32 = arith.constant 0 : i32
    %c0_i32_0 = arith.constant 0 : i32
    return %arg0, %c0_i32 : i32, i32
  }
  func.func @transform_1(%arg0: i32) -> (i32, i32) {
    %c0_i32 = arith.constant 0 : i32
    %c0_i32_0 = arith.constant 0 : i32
    %c0_i32_1 = arith.constant 0 : i32
    return %c0_i32, %c0_i32_0 : i32, i32
  }
  func.func @transform_2(%arg0: i32) -> (i32, i32) {
    %c0_i32 = arith.constant 0 : i32
    %c0_i32_0 = arith.constant 0 : i32
    %c0_i32_1 = arith.constant 0 : i32
    return %c0_i32, %c0_i32_0 : i32, i32
  }
  func.func @transform_3(%arg0: i32) -> (i32, i32) {
    %c0_i32 = arith.constant 0 : i32
    %c0_i32_0 = arith.constant 0 : i32
    %c0_i32_1 = arith.constant 0 : i32
    return %c0_i32, %c0_i32_0 : i32, i32
  }
  func.func @transform_4(%arg0: i32) -> (i32, i32) {
    %c0_i32 = arith.constant 0 : i32
    %c0_i32_0 = arith.constant 0 : i32
    %c0_i32_1 = arith.constant 0 : i32
    return %c0_i32, %c0_i32_0 : i32, i32
  }
  func.func @transform_5(%arg0: i32) -> (i32, i32) {
    %c0_i32 = arith.constant 0 : i32
    %c0_i32_0 = arith.constant 0 : i32
    %c0_i32_1 = arith.constant 0 : i32
    return %c0_i32, %c0_i32_0 : i32, i32
  }
  func.func @transform_6(%arg0: i32) -> (i32, i32) {
    %c0_i32 = arith.constant 0 : i32
    %c0_i32_0 = arith.constant 0 : i32
    %c0_i32_1 = arith.constant 0 : i32
    return %c0_i32, %c0_i32_0 : i32, i32
  }
  func.func @transform_7(%arg0: i32) -> (i32, i32) {
    %c0_i32 = arith.constant 0 : i32
    %c0_i32_0 = arith.constant 0 : i32
    %c0_i32_1 = arith.constant 0 : i32
    return %c0_i32, %c0_i32_0 : i32, i32
  }
  func.func @transform_8(%arg0: i32) -> (i32, i32) {
    %c0_i32 = arith.constant 0 : i32
    %c0_i32_0 = arith.constant 0 : i32
    %c0_i32_1 = arith.constant 0 : i32
    return %c0_i32, %c0_i32_0 : i32, i32
  }
  func.func @transform_9(%arg0: i32) -> (i32, i32) {
    %c0_i32 = arith.constant 0 : i32
    %c0_i32_0 = arith.constant 0 : i32
    return %arg0, %c0_i32 : i32, i32
  }
}

</mosaic_0001>

<bundles_post_ra>
// kernel: convnext_block.1
= control target key start
LH: loop header
LB: loop body
LE: loop exit
PB: predicated region body
PF: predicated region fallthrough
CT: control target
= control target key end

     0   :  { %v38_v2 = vlaneseq  ;;  %s1214_s0 = inlined_call_operand.vmem [shape: f32[32,32], index: 0, kind: input, shape index: {}]   ;;  %s1215_s1 = inlined_call_operand.vmem [shape: f32[7,32], index: 1, kind: input, shape index: {}]   ;;  %s1216_s2 = inlined_call_operand.vmem [shape: f32[1,32], index: 2, kind: input, shape index: {}]   ;;  %s1217_s3 = inlined_call_operand.vmem [shape: f32[1,32], index: 3, kind: input, shape index: {}]   ;;  %s1218_s4 = inlined_call_operand.vmem [shape: f32[1,32], index: 4, kind: input, shape index: {}]   ;;  %s1219_s5 = inlined_call_operand.vmem [shape: bf16[32,64], index: 5, kind: input, shape index: {}]   ;;  %s1220_s6 = inlined_call_operand.vmem [shape: f32[1,64], index: 6, kind: input, shape index: {}]   ;;  %s1221_s7 = inlined_call_operand.vmem [shape: bf16[64,32], index: 7, kind: input, shape index: {}]   ;;  %s1222_s8 = inlined_call_operand.vmem [shape: f32[1,32], index: 8, kind: input, shape index: {}]   ;;  %s1223_s9 = inlined_call_operand.hbm [shape: f32[32,32], index: 9, kind: output, shape index: {}]  }
   0x1   :  { %v887_v0 = vld [vmem:[%s1214_s0 + $0x10] sm:$0xff]  ;;  %v892_v1 = vld [vmem:[%s1214_s0 + $0x18] sm:$0xff]  ;;  %v897_v3 = vld [vmem:[%s1214_s0] sm:$0xff] }
   0x2   :  { %v94_v4 = vrot.slane %v887_v0, 5  ;;  %v95_v5 = vrot.slane %v892_v1, 5  ;;  %v131_v6 = vrot.slane %v887_v0, 6  ;;  %v132_v7 = vrot.slane %v892_v1, 6  ;;  %v91_v12 = vld [vmem:[%s1215_s1] sm:$0x7f] }
   0x3   :  { %v903_v8 = vshrl.u32 %v38_v2, 7  ;;  %v168_v9 = vrot.slane %v887_v0, 7  ;;  %v169_v10 = vrot.slane %v892_v1, 7  ;;  %v215_v11 = vrot.slane %v897_v3, 1 }
   0x4   :  { %v218_v13 = vrot.slane %v892_v1, 1  ;;  %v252_v14 = vrot.slane %v897_v3, 2  ;;  %v255_v15 = vrot.slane %v892_v1, 2  ;;  %v289_v16 = vrot.slane %v897_v3, 3 }
   0x5   :  { %v42_v17 = vadd.s32 24, %v903_v8  ;;  %vm96_vm0 = vcmp.lt.s32.totalorder %v903_v8, 3  ;;  %v119_v18 = vsub.s32 0, %v903_v8  ;;  %vm133_vm1 = vcmp.lt.s32.totalorder %v903_v8, 2 }
   0x6   :  { %v97_v19 = vsel %vm96_vm0, %v94_v4, %v95_v5  ;;  %v134_v20 = vsel %vm133_vm1, %v131_v6, %v132_v7  ;;  %v156_v21 = vsub.s32 1, %v903_v8  ;;  %vm170_vm2 = vcmp.lt.s32.totalorder %v903_v8, 1 }
   0x7   :  { %v68_v22 = vand.u32 15, %v42_v17  ;;  %v931_v23 = vrot.slane %v91_v12, %v119_v18  ;;  %v171_v24 = vsel %vm170_vm2, %v168_v9, %v169_v10  ;;  %v193_v25 = vsub.s32 2, %v903_v8 }
   0x8   :  { %v940_v26 = vrot.slane %v91_v12, %v156_v21  ;;  %v205_v27 = vsub.s32 3, %v903_v8  ;;  %vm219_vm3 = vcmp.lt.s32.totalorder %v903_v8, 7  ;;  %v242_v28 = vsub.s32 4, %v903_v8 }
   0x9   :  { %v124_v29 = vmul.f32 %v931_v23, %v97_v19  ;;  %v946_v30 = vrot.slane %v91_v12, %v193_v25  ;;  %v223_v31 = vsel %vm219_vm3, %v218_v13, %v215_v11  ;;  %vm227_vm4 = vcmp.lt.s32.totalorder %v68_v22, 15 }
   0xa   :  { %v161_v32 = vmul.f32 %v940_v26, %v134_v20  ;;  %v955_v33 = vrot.slane %v91_v12, %v205_v27  ;;  %v239_v34 = vsel %vm227_vm4, %v223_v31, 0.0  ;;  %v957_v35 = vrot.slane %v91_v12, %v242_v28 }
   0xb   :  { %v198_v36 = vmul.f32 %v946_v30, %v171_v24  ;;  %vm256_vm5 = vcmp.lt.s32.totalorder %v903_v8, 6  ;;  %vm264_vm6 = vcmp.lt.s32.totalorder %v68_v22, 14  ;;  %v279_v37 = vsub.s32 5, %v903_v8 }
   0xc   :  { %v165_v38 = vadd.f32 %v161_v32, %v124_v29  ;;  %v210_v39 = vmul.f32 %v955_v33, %v892_v1  ;;  %v247_v40 = vmul.f32 %v957_v35, %v239_v34  ;;  %v260_v41 = vsel %vm256_vm5, %v255_v15, %v252_v14 }
   0xd   :  { %14 = vsyncpa [#allocation3], 0  ;;  %v276_v42 = vsel %vm264_vm6, %v260_v41, 0.0  ;;  %v971_v43 = vrot.slane %v91_v12, %v279_v37  ;;  %v292_v44 = vrot.slane %v892_v1, 3  ;;  %vm293_vm7 = vcmp.lt.s32.totalorder %v903_v8, 5  ;;  %v1003_v62 = vld [vmem:[%s1214_s0 + $0x8] sm:$0xff] }
   0xe   :  { %v202_v45 = vadd.f32 %v198_v36, %v165_v38  ;;  %vm301_vm8 = vcmp.lt.s32.totalorder %v68_v22, 13  ;;  %v316_v46 = vsub.s32 6, %v903_v8  ;;  %v47_v47 = vand.u32 15, %v903_v8  ;;  %v1019_v19 = vld [vmem:[%s1216_s2] ss:$0 sm:$0xff]  ;;  %s831_s12 = smov [#allocation2]  }
   0xf   :  { %v284_v48 = vmul.f32 %v971_v43, %v276_v42  ;;  %v297_v49 = vsel %vm293_vm7, %v292_v44, %v289_v16  ;;  %vm337_vm9 = vcmask 261120   ;;  %v92_v50 = vrot.slane %v897_v3, 5  ;;  %s718_s13 = sshll.u32 %s831_s12, 4  ;;  %s719_s13 = int_to_ptr.vmem [resolvable:$true] %s718_s13 }
  0x10   :  { %v129_v51 = vrot.slane %v897_v3, 6  ;;  %v214_v52 = vadd.f32 %v210_v39, %v202_v45  ;;  %v313_v53 = vsel %vm301_vm8, %v297_v49, 0.0  ;;  %v986_v54 = vrot.slane %v91_v12, %v316_v46  ;;  %p813_p1 = scmp.lt.s32.totalorder %s719_s13, %s719_s13 }
  0x11   :  { %vm101_vm10 = vcmp.ge.s32.totalorder %v47_v47, 3  ;;  %v100_v55 = vsel %vm96_vm0, %v95_v5, %v92_v50  ;;  %vm138_vm11 = vcmp.ge.s32.totalorder %v47_v47, 2  ;;  %v166_v57 = vrot.slane %v897_v3, 7 }
  0x12   :  { %v137_v56 = vsel %vm133_vm1, %v132_v7, %v129_v51  ;;  %v251_v58 = vadd.f32 %v247_v40, %v214_v52  ;;  %v321_v59 = vmul.f32 %v986_v54, %v313_v53  ;;  %v113_v60 = vsel %vm101_vm10, %v100_v55, 0.0 }
  0x13   :  { %v150_v61 = vsel %vm138_vm11, %v137_v56, 0.0  ;;  %v121_v63 = vmul.f32 %v931_v23, %v113_v60  ;;  %v174_v5 = vsel %vm170_vm2, %v169_v10, %v166_v57  ;;  %vm175_vm12 = vcmp.ge.s32.totalorder %v47_v47, 1 }
  0x14   :  { %v158_v2 = vmul.f32 %v940_v26, %v150_v61  ;;  %v288_v7 = vadd.f32 %v284_v48, %v251_v58  ;;  %v187_v12 = vsel %vm175_vm12, %v174_v5, 0.0  ;;  %v207_v17 = vmul.f32 %v955_v33, %v897_v3 }
  0x15   :  { %v216_v18 = vrot.slane %v1003_v62, 1  ;;  %v195_v21 = vmul.f32 %v946_v30, %v187_v12  ;;  %v253_v22 = vrot.slane %v1003_v62, 2  ;;  %v290_v10 = vrot.slane %v1003_v62, 3 }
  0x16   :  { %v162_v20 = vadd.f32 %v158_v2, %v121_v63  ;;  %v325_v24 = vadd.f32 %v321_v59, %v288_v7  ;;  %v41_v27 = vadd.s32 16, %v903_v8  ;;  %v93_v28 = vrot.slane %v1003_v62, 5 }
  0x17   :  { %v222_v25 = vsel %vm219_vm3, %v215_v11, %v216_v18  ;;  %v259_v32 = vsel %vm256_vm5, %v252_v14, %v253_v22  ;;  %v296_v34 = vsel %vm293_vm7, %v289_v16, %v290_v10  ;;  %v130_v40 = vrot.slane %v1003_v62, 6 }
  0x18   :  { %v199_v29 = vadd.f32 %v195_v21, %v162_v20  ;;  %v244_v31 = vmul.f32 %v957_v35, %v222_v25  ;;  %v1042_v11 = vadd.f32 %v1019_v19, %v325_v24  ;;  %v281_v36 = vmul.f32 %v971_v43, %v259_v32 }
  0x19   :  { %v318_v37 = vmul.f32 %v986_v54, %v296_v34  ;;  %v61_v38 = vand.u32 15, %v41_v27  ;;  %v98_v14 = vsel %vm96_vm0, %v93_v28, %v94_v4  ;;  %v167_v41 = vrot.slane %v1003_v62, 7 }
  0x1a   :  { %v211_v39 = vadd.f32 %v207_v17, %v199_v29  ;;  %v347_v16 = vsel %vm337_vm9, %v1042_v11, 0.0  ;;  %v135_v46 = vsel %vm133_vm1, %v130_v40, %v131_v6  ;;  %v217_v56 = vrot.slane %v887_v0, 1 }
  0x1b   :  { %vm103_vm13 = vcmp.ge.s32.totalorder %v61_v38, 3  ;;  %vm140_vm14 = vcmp.ge.s32.totalorder %v61_v38, 2  ;;  %vm177_vm15 = vcmp.ge.s32.totalorder %v61_v38, 1  ;;  %348 = vadd.xlane.f32.xlu1 %v347_v16  ;;  %v172_v4 = vsel %vm170_vm2, %v167_v41, %v168_v9 }
  0x1c   :  { %v248_v42 = vadd.f32 %v244_v31, %v211_v39  ;;  %v115_v45 = vsel %vm103_vm13, %v98_v14, 0.0  ;;  %v152_v48 = vsel %vm140_vm14, %v135_v46, 0.0  ;;  %v189_v49 = vsel %vm177_vm15, %v172_v4, 0.0 }
  0x1d   :  { %v123_v47 = vmul.f32 %v931_v23, %v115_v45  ;;  %v160_v53 = vmul.f32 %v940_v26, %v152_v48  ;;  %v197_v55 = vmul.f32 %v946_v30, %v189_v49  ;;  %v254_v58 = vrot.slane %v887_v0, 2  ;;  %v778_v49 = vld [vmem:[%s1219_s5 + $0x8] sm:$0xff]  }
  0x1e   :  { %v285_v52 = vadd.f32 %v281_v36, %v248_v42  ;;  %v291_v6 = vrot.slane %v887_v0, 3  ;;  %v40_v59 = vadd.s32 8, %v903_v8  ;;  %v99_v9 = vsel %vm96_vm0, %v92_v50, %v93_v28  ;;  %754 = vmatprep.subr.bf16.mxu0 %v778_v49 }
  0x1f   :  { %v164_v61 = vadd.f32 %v160_v53, %v123_v47  ;;  %v209_v63 = vmul.f32 %v955_v33, %v887_v0  ;;  %v220_v2 = vsel %vm219_vm3, %v217_v56, %v218_v13  ;;  %v257_v5 = vsel %vm256_vm5, %v254_v58, %v255_v15  ;;  %755 = vmatpush3.bf16.msra.mxu0 %v778_v49  ;;  %v782_v49 = vld [vmem:[%s1221_s7 + $0x8] sm:$0xff]  }
  0x20   :  { %v322_v60 = vadd.f32 %v318_v37, %v285_v52  ;;  %v294_v50 = vsel %vm293_vm7, %v291_v6, %v292_v44  ;;  %v54_v7 = vand.u32 15, %v40_v59  ;;  %v122_v12 = vmul.f32 %v931_v23, %v99_v9  ;;  %v779_v52 = vld [vmem:[%s1219_s5] sm:$0xff]  }
  0x21   :  { %v201_v20 = vadd.f32 %v197_v55, %v164_v61  ;;  %v246_v21 = vmul.f32 %v957_v35, %v220_v2  ;;  %v283_v13 = vmul.f32 %v971_v43, %v257_v5  ;;  %v320_v24 = vmul.f32 %v986_v54, %v294_v50  ;;  %756 = vmatprep.subr.bf16.mxu0 %v779_v52 }
  0x22   :  { %v1089_v17 = vadd.f32 %v1019_v19, %v322_v60  ;;  %v136_v15 = vsel %vm133_vm1, %v129_v51, %v130_v40  ;;  %v173_v23 = vsel %vm170_vm2, %v166_v57, %v167_v41  ;;  %v221_v44 = vsel %vm219_vm3, %v216_v18, %v217_v56 }
  0x23   :  { %v213_v27 = vadd.f32 %v209_v63, %v201_v20  ;;  %v159_v28 = vmul.f32 %v940_v26, %v136_v15  ;;  %v196_v29 = vmul.f32 %v946_v30, %v173_v23  ;;  %v208_v51 = vmul.f32 %v955_v33, %v1003_v62  ;;  %757 = vmatpush3.bf16.msra.mxu0 %v779_v52  ;;  %v783_v52 = vld [vmem:[%s1221_s7] sm:$0xff]  }
  0x24   :  { %v338_v25 = vsel %vm337_vm9, %v1089_v17, 0.0  ;;  %vm225_vm0 = vcmp.lt.s32.totalorder %v54_v7, 15  ;;  %v258_v31 = vsel %vm256_vm5, %v253_v22, %v254_v58  ;;  %vm262_vm1 = vcmp.lt.s32.totalorder %v54_v7, 14 }
  0x25   :  { %339 = vadd.xlane.f32.xlu0 %v338_v25  ;;  %v250_v57 = vadd.f32 %v246_v21, %v213_v27  ;;  %v163_v32 = vadd.f32 %v159_v28, %v122_v12  ;;  %v237_v18 = vsel %vm225_vm0, %v221_v44, 0.0  ;;  %v295_v34 = vsel %vm293_vm7, %v290_v10, %v291_v6 }
  0x26   :  { %v274_v26 = vsel %vm262_vm1, %v258_v31, 0.0  ;;  %vm299_vm2 = vcmp.lt.s32.totalorder %v54_v7, 13  ;;  %v245_v37 = vmul.f32 %v957_v35, %v237_v18  ;;  %v350_v35 = vmul.f32 %v1089_v17, %v1089_v17 }
  0x27   :  { %v287_v30 = vadd.f32 %v283_v13, %v250_v57  ;;  %v200_v36 = vadd.f32 %v196_v29, %v163_v32  ;;  %v311_v33 = vsel %vm299_vm2, %v295_v34, 0.0  ;;  %v282_v22 = vmul.f32 %v971_v43, %v274_v26 }
  0x28   :  { %v319_v41 = vmul.f32 %v986_v54, %v311_v33  ;;  %v353_v46 = vmul.f32 %v1042_v11, %v1042_v11  ;;  %v354_v4 = vsel %vm337_vm9, %v350_v35, 0.0  ;;  %vm649_vm7 = vcmask 523264  }
  0x29   :  { %v324_v38 = vadd.f32 %v320_v24, %v287_v30  ;;  %v212_v39 = vadd.f32 %v208_v51, %v200_v36  ;;  %v730_v36 = vld [vmem:[%s1217_s3] ss:$0 sm:$0xff] }
  0x2b   :  { %v1119_v14 = vadd.f32 %v1019_v19, %v324_v38  ;;  %v249_v40 = vadd.f32 %v245_v37, %v212_v39  ;;  %v731_v39 = vld [vmem:[%s1218_s4] ss:$0 sm:$0xff] }
  0x2d   :  { %v344_v8 = vsel %vm337_vm9, %v1119_v14, 0.0  ;;  %v286_v10 = vadd.f32 %v282_v22, %v249_v40  ;;  %v352_v47 = vmul.f32 %v1119_v14, %v1119_v14 }
  0x2e   :  { %345 = vadd.xlane.f32.xlu1 %v344_v8 }
  0x2f   :  { %v323_v16 = vadd.f32 %v319_v41, %v286_v10  ;;  %v360_v48 = vsel %vm337_vm9, %v352_v47, 0.0 }
  0x31   :  { %v334_v42 = vadd.f32 %v1019_v19, %v323_v16  ;;  %v363_v19 = vsel %vm337_vm9, %v353_v46, 0.0 }
  0x33   :  { %v341_v45 = vsel %vm337_vm9, %v334_v42, 0.0  ;;  %v351_v43 = vmul.f32 %v334_v42, %v334_v42 }
  0x34   :  { %342 = vadd.xlane.f32.xlu0 %v341_v45 }
  0x35   :  { %v357_v54 = vsel %vm337_vm9, %v351_v43, 0.0 }
  0x36   :  { %358 = vadd.xlane.f32.xlu1 %v357_v54 }
  0x38   :  { %355 = vadd.xlane.f32.xlu0 %v354_v4 }
  0x3a   :  { %364 = vadd.xlane.f32.xlu1 %v363_v19 }
  0x3c   :  { %361 = vadd.xlane.f32.xlu0 %v360_v48 }
  0xa4   :  { %v349_v53 = vpop.xlane.xlu1 %348 }
  0xa5   :  { %v369_v60 = vmul.f32 0.03125, %v349_v53  ;;  %v732_v53 = vld [vmem:[%s1220_s6] ss:$0 sm:$0xff] }
  0xa7   :  { %v377_v21 = vmul.f32 %v369_v60, %v369_v60  ;;  %v389_v22 = vsub.f32 %v1042_v11, %v369_v60  ;;  %v780_v11 = vld [vmem:[%s1221_s7 + $0x18] sm:$0xff]  }
  0xa8   :  { %762 = vmatprep.subr.bf16.mxu1 %v780_v11 }
  0xa9   :  { %763 = vmatpush3.bf16.msra.mxu1 %v780_v11 }
  0xae   :  { %v340_v55 = vpop.xlane.xlu0 %339 }
  0xaf   :  { %v366_v6 = vmul.f32 0.03125, %v340_v55 }
  0xb1   :  { %v374_v50 = vmul.f32 %v366_v6, %v366_v6  ;;  %v386_v37 = vsub.f32 %v1089_v17, %v366_v6 }
  0xb7   :  { %v346_v56 = vpop.xlane.xlu1 %345 }
  0xb8   :  { %v368_v2 = vmul.f32 0.03125, %v346_v56 }
  0xba   :  { %v376_v23 = vmul.f32 %v368_v2, %v368_v2  ;;  %v388_v10 = vsub.f32 %v1119_v14, %v368_v2  ;;  %v781_v14 = vld [vmem:[%s1221_s7 + $0x10] sm:$0xff]  }
  0xbb   :  { %764 = vmatprep.subr.bf16.mxu1 %v781_v14 }
  0xbc   :  { %765 = vmatpush3.bf16.msra.mxu1 %v781_v14 }
  0xbd   :  { %v343_v58 = vpop.xlane.xlu0 %342  ;;  %766 = vmatprep.subr.bf16.mxu1 %v782_v49 }
  0xbe   :  { %v367_v59 = vmul.f32 0.03125, %v343_v58 }
  0xbf   :  { %v359_v9 = vpop.xlane.xlu1 %358 }
  0xc0   :  { %v375_v61 = vmul.f32 %v367_v59, %v367_v59  ;;  %v371_v63 = vmul.f32 0.03125, %v359_v9  ;;  %v387_v26 = vsub.f32 %v334_v42, %v367_v59  ;;  %767 = vmatpush3.bf16.msra.mxu1 %v782_v49 }
  0xc1   :  { %v356_v5 = vpop.xlane.xlu0 %355  ;;  %768 = vmatprep.subr.bf16.mxu1 %v783_v52 }
  0xc2   :  { %v379_v7 = vsub.f32 %v371_v63, %v375_v61  ;;  %v370_v12 = vmul.f32 0.03125, %v356_v5 }
  0xc3   :  { %v365_v20 = vpop.xlane.xlu1 %364 }
  0xc4   :  { %v383_v13 = vmax.f32 %v379_v7, 0.0  ;;  %v378_v24 = vsub.f32 %v370_v12, %v374_v50  ;;  %v373_v15 = vmul.f32 0.03125, %v365_v20  ;;  %769 = vmatpush3.bf16.msra.mxu1 %v783_v52 }
  0xc5   :  { %v362_v44 = vpop.xlane.xlu0 %361 }
  0xc6   :  { %v391_v25 = vadd.f32 1e-05, %v383_v13  ;;  %v382_v27 = vmax.f32 %v378_v24, 0.0  ;;  %v381_v28 = vsub.f32 %v373_v15, %v377_v21  ;;  %v372_v29 = vmul.f32 0.03125, %v362_v44 }
  0xc8   :  { %784 = vrsqrt.f32 %v391_v25  ;;  %v390_v51 = vadd.f32 1e-05, %v382_v27  ;;  %v385_v31 = vmax.f32 %v381_v28, 0.0  ;;  %v380_v57 = vsub.f32 %v372_v29, %v376_v23 }
  0xca   :  { %786 = vrsqrt.f32 %v390_v51  ;;  %v393_v32 = vadd.f32 1e-05, %v385_v31  ;;  %v384_v18 = vmax.f32 %v380_v57, 0.0 }
  0xcc   :  { %788 = vrsqrt.f32 %v393_v32  ;;  %v392_v34 = vadd.f32 1e-05, %v384_v18 }
  0xce   :  { %790 = vrsqrt.f32 %v392_v34 }
  0xd5   :  { %v785_v30 = vpop.eup %784 }
  0xd6   :  { %v399_v33 = vmul.f32 %v785_v30, %v387_v26 }
  0xd7   :  { %v787_v38 = vpop.eup %786 }
  0xd8   :  { %v398_v40 = vmul.f32 %v787_v38, %v386_v37  ;;  %v410_v41 = vmul.f32 %v730_v36, %v399_v33 }
  0xd9   :  { %v789_v8 = vpop.eup %788 }
  0xda   :  { %v409_v16 = vmul.f32 %v730_v36, %v398_v40  ;;  %v421_v42 = vadd.f32 %v731_v39, %v410_v41  ;;  %v401_v35 = vmul.f32 %v789_v8, %v389_v22 }
  0xdb   :  { %v791_v45 = vpop.eup %790 }
  0xdc   :  { %v420_v43 = vadd.f32 %v731_v39, %v409_v16  ;;  %v400_v46 = vmul.f32 %v791_v45, %v388_v10  ;;  %v412_v17 = vmul.f32 %v730_v36, %v401_v35 }
  0xde   :  { %v424_v54 = vpack.c.bf16 %v421_v42, %v420_v43  ;;  %v411_v4 = vmul.f32 %v730_v36, %v400_v46  ;;  %v423_v47 = vadd.f32 %v731_v39, %v412_v17 }
  0xe0   :  { %758 = vmatprep.mubr.msk.bf16.mxu0 %vm337_vm9, %v424_v54  ;;  %v422_v19 = vadd.f32 %v731_v39, %v411_v4 }
  0xe2   :  { %v425_v48 = vpack.c.bf16 %v423_v47, %v422_v19 }
  0xe4   :  { %759 = vmatmul.mubr.msk.bf16.vlgmr.msra.gmra.mxu0 %vm337_vm9, %v425_v48 }
 0x1a4   :  { %v760_v55 = vpop.f32.mrf.mxu0 }
 0x1a5   :  { %v1168_v56 = vadd.f32 %v760_v55, %v732_v53 }
 0x1a6   :  { %v489_v58 = vpop.f32.mrf.mxu0 }
 0x1a7   :  { %v1171_v6 = vmul.f32 0.70710677, %v1168_v56  ;;  %v1173_v59 = vadd.f32 %v732_v53, %v489_v58 }
 0x1a8   :  { %v761_v9 = vpop.f32.mrf.mxu0 }
 0x1a9   :  { %v522_v60 = vand.u32 2147483647, %v1171_v6  ;;  %v1177_v61 = vmul.f32 0.70710677, %v1173_v59  ;;  %v1179_v63 = vadd.f32 %v761_v9, %v732_v53  ;;  %vm514_vm3 = vcmp.ge.f32.partialorder %v1171_v6, 0.0 }
 0x1aa   :  { %v492_v2 = vpop.f32.mrf.mxu0 }
 0x1ab   :  { %v526_v5 = vmul.f32 0.3275911, %v522_v60  ;;  %v520_v50 = vand.u32 2147483647, %v1177_v61  ;;  %v1183_v7 = vmul.f32 0.70710677, %v1179_v63  ;;  %v1185_v12 = vadd.f32 %v732_v53, %v492_v2 }
 0x1ac   :  { %v574_v29 = vsub.f32 0.0, %v522_v60  ;;  %vm512_vm4 = vcmp.ge.f32.partialorder %v1177_v61, 0.0 }
 0x1ad   :  { %v530_v20 = vadd.f32 1.0, %v526_v5  ;;  %v524_v21 = vmul.f32 0.3275911, %v520_v50  ;;  %v523_v13 = vand.u32 2147483647, %v1183_v7  ;;  %v572_v51 = vsub.f32 0.0, %v520_v50 }
 0x1ae   :  { %v1189_v24 = vmul.f32 0.70710677, %v1185_v12  ;;  %v578_v31 = vmul.f32 %v574_v29, %v522_v60  ;;  %vm515_vm5 = vcmp.ge.f32.partialorder %v1183_v7, 0.0 }
 0x1af   :  { %792 = vrcp.f32 %v530_v20  ;;  %v528_v15 = vadd.f32 1.0, %v524_v21  ;;  %v527_v23 = vmul.f32 0.3275911, %v523_v13  ;;  %v575_v57 = vsub.f32 0.0, %v523_v13 }
 0x1b0   :  { %v521_v44 = vand.u32 2147483647, %v1189_v24  ;;  %v576_v18 = vmul.f32 %v572_v51, %v520_v50  ;;  %v584_v30 = vmul.f32 1.442695, %v578_v31  ;;  %vm513_vm6 = vcmp.ge.f32.partialorder %v1189_v24, 0.0 }
 0x1b1   :  { %794 = vrcp.f32 %v528_v15  ;;  %v531_v25 = vadd.f32 1.0, %v527_v23  ;;  %v579_v36 = vmul.f32 %v575_v57, %v523_v13 }
 0x1b2   :  { %v525_v27 = vmul.f32 0.3275911, %v521_v44  ;;  %v573_v26 = vsub.f32 0.0, %v521_v44  ;;  %v580_v38 = vmul.f32 1.442695, %v576_v18 }
 0x1b3   :  { %796 = vrcp.f32 %v531_v25  ;;  %v586_v10 = vmul.f32 1.442695, %v579_v36  ;;  %v830_v36 = vmov -1.0  }
 0x1b4   :  { %v529_v28 = vadd.f32 1.0, %v525_v27  ;;  %v577_v41 = vmul.f32 %v573_v26, %v521_v44 }
 0x1b6   :  { %798 = vrcp.f32 %v529_v28  ;;  %v582_v17 = vmul.f32 1.442695, %v577_v41 }
 0x1b7   :  { %800 = vpow2.f32 %v584_v30 }
 0x1b8   :  { %802 = vpow2.f32 %v580_v38 }
 0x1b9   :  { %804 = vpow2.f32 %v586_v10  ;;  %v517_v10 = vsel %vm513_vm6, 1.0, %v830_v36 }
 0x1ba   :  { %806 = vpow2.f32 %v582_v17  ;;  %v506_v17 = vmul.f32 0.5, %v1168_v56 }
 0x1bc   :  { %v793_v32 = vpop.eup %792 }
 0x1bd   :  { %v538_v34 = vmul.f32 1.0614054, %v793_v32 }
 0x1be   :  { %v795_v37 = vpop.eup %794 }
 0x1bf   :  { %v542_v33 = vadd.f32 -1.4531521, %v538_v34  ;;  %v536_v39 = vmul.f32 1.0614054, %v795_v37 }
 0x1c0   :  { %v797_v22 = vpop.eup %796 }
 0x1c1   :  { %v546_v40 = vmul.f32 %v793_v32, %v542_v33  ;;  %v539_v8 = vmul.f32 1.0614054, %v797_v22  ;;  %v540_v16 = vadd.f32 -1.4531521, %v536_v39  ;;  %v518_v33 = vsel %vm514_vm3, 1.0, %v830_v36 }
 0x1c2   :  { %v519_v39 = vsel %vm515_vm5, 1.0, %v830_v36 }
 0x1c3   :  { %v550_v42 = vadd.f32 1.4214138, %v546_v40  ;;  %v799_v35 = vpop.eup %798  ;;  %v543_v45 = vadd.f32 -1.4531521, %v539_v8  ;;  %v544_v43 = vmul.f32 %v795_v37, %v540_v16 }
 0x1c4   :  { %v537_v54 = vmul.f32 1.0614054, %v799_v35  ;;  %v801_v13 = vpop.eup %800 }
 0x1c5   :  { %v554_v46 = vmul.f32 %v793_v32, %v550_v42  ;;  %v547_v4 = vmul.f32 %v797_v22, %v543_v45  ;;  %v548_v47 = vadd.f32 1.4214138, %v544_v43  ;;  %v803_v27 = vpop.eup %802  ;;  %v504_v45 = vmul.f32 0.5, %v1173_v59 }
 0x1c6   :  { %v541_v48 = vadd.f32 -1.4531521, %v537_v54  ;;  %v805_v31 = vpop.eup %804  ;;  %v505_v43 = vmul.f32 0.5, %v1185_v12 }
 0x1c7   :  { %v558_v19 = vadd.f32 -0.28449672, %v554_v46  ;;  %v551_v11 = vadd.f32 1.4214138, %v547_v4  ;;  %v552_v14 = vmul.f32 %v795_v37, %v548_v47  ;;  %v807_v30 = vpop.eup %806 }
 0x1c8   :  { %v545_v52 = vmul.f32 %v799_v35, %v541_v48 }
 0x1c9   :  { %v562_v49 = vmul.f32 %v793_v32, %v558_v19  ;;  %v555_v53 = vmul.f32 %v797_v22, %v551_v11  ;;  %v556_v55 = vadd.f32 -0.28449672, %v552_v14 }
 0x1ca   :  { %v549_v9 = vadd.f32 1.4214138, %v545_v52 }
 0x1cb   :  { %v566_v58 = vadd.f32 0.2548296, %v562_v49  ;;  %v559_v60 = vadd.f32 -0.28449672, %v555_v53  ;;  %v560_v2 = vmul.f32 %v795_v37, %v556_v55 }
 0x1cc   :  { %v553_v50 = vmul.f32 %v799_v35, %v549_v9 }
 0x1cd   :  { %v570_v5 = vmul.f32 %v793_v32, %v566_v58  ;;  %v563_v20 = vmul.f32 %v797_v22, %v559_v60  ;;  %v564_v21 = vadd.f32 0.2548296, %v560_v2 }
 0x1ce   :  { %v557_v15 = vadd.f32 -0.28449672, %v553_v50 }
 0x1cf   :  { %v590_v23 = vmul.f32 %v801_v13, %v570_v5  ;;  %v567_v44 = vadd.f32 0.2548296, %v563_v20  ;;  %v568_v25 = vmul.f32 %v795_v37, %v564_v21  ;;  %v516_v37 = vsel %vm512_vm4, 1.0, %v830_v36 }
 0x1d0   :  { %v561_v28 = vmul.f32 %v799_v35, %v557_v15 }
 0x1d1   :  { %v571_v29 = vmul.f32 %v797_v22, %v567_v44  ;;  %v588_v51 = vmul.f32 %v803_v27, %v568_v25  ;;  %v594_v18 = vsub.f32 1.0, %v590_v23 }
 0x1d2   :  { %v565_v57 = vadd.f32 0.2548296, %v561_v28 }
 0x1d3   :  { %v591_v32 = vmul.f32 %v805_v31, %v571_v29  ;;  %v592_v34 = vsub.f32 1.0, %v588_v51  ;;  %v598_v6 = vmul.f32 %v594_v18, %v518_v33 }
 0x1d4   :  { %v569_v26 = vmul.f32 %v799_v35, %v565_v57  ;;  %v507_v35 = vmul.f32 0.5, %v1179_v63  ;;  %v737_v63 = vld [vmem:[%s1222_s8] ss:$0 sm:$0xff]  ;;  %s808_s8 = scalar_lea.vmem %s719_s13, 512 }
 0x1d5   :  { %v595_v38 = vsub.f32 1.0, %v591_v32  ;;  %v596_v40 = vmul.f32 %v592_v34, %v516_v37  ;;  %v602_v42 = vadd.f32 1.0, %v598_v6  ;;  %p809_p0 = scmp.ne.s32.totalorder %s719_s13, %s808_s8  ;;  %p814_p2 = scmp.lt.s32.totalorder %s808_s8, %s808_s8 }
 0x1d6   :  { %v589_v22 = vmul.f32 %v807_v30, %v569_v26 }
 0x1d7   :  { %v599_v41 = vmul.f32 %v595_v38, %v519_v39  ;;  %v600_v7 = vadd.f32 1.0, %v596_v40  ;;  %v606_v47 = vmul.f32 %v602_v42, %v506_v17  ;;  %p815_p3 = por %p814_p2, %p813_p1 }
 0x1d8   :  { %v593_v61 = vsub.f32 1.0, %v589_v22 }
 0x1d9   :  { %v603_v8 = vadd.f32 1.0, %v599_v41  ;;  %v604_v54 = vmul.f32 %v600_v7, %v504_v45  ;;  %p816_p4 = pnand %p815_p3, %p809_p0 }
 0x1da   :  { %v597_v16 = vmul.f32 %v593_v61, %v517_v10 }
 0x1db   :  { %v607_v24 = vmul.f32 %v603_v8, %v507_v35 }
 0x1dc   :  { %v601_v46 = vadd.f32 1.0, %v597_v16 }
 0x1dd   :  { %v609_v48 = vpack.c.bf16 %v607_v24, %v606_v47 }
 0x1de   :  { %v605_v4 = vmul.f32 %v601_v46, %v505_v43 }
 0x1e0   :  { %v608_v19 = vpack.c.bf16 %v605_v4, %v604_v54 }
 0x1e2   :  { %770 = vmatprep.mubr.msk.bf16.mxu1 %vm649_vm7, %v608_v19 }
 0x1e3   :  { %771 = vmatmul.mubr.msk.bf16.vlgmr.msra.gmra.mxu1 %vm649_vm7, %v609_v48 }
 0x2a3   :  { %v772_v11 = vpop.f32.mrf.mxu1 }
 0x2a4   :  { %v699_v59 = vadd.f32 %v772_v11, %v737_v63 }
 0x2a5   :  { %v690_v14 = vpop.f32.mrf.mxu1 }
 0x2a6   :  { %v707_v12 = vadd.f32 %v699_v59, %v887_v0  ;;  %v691_v49 = vadd.f32 %v737_v63, %v690_v14 }
 0x2a7   :  { %v773_v56 = vpop.f32.mrf.mxu1 }
 0x2a8   :  { %711 = vst.msk [vmem:[#allocation2 + $0x10] sm:$0xff] %vm337_vm9, %v707_v12  ;;  %v705_v52 = vadd.f32 %v691_v49, %v897_v3  ;;  %v702_v53 = vadd.f32 %v773_v56, %v737_v63 }
 0x2a9   :  { %v693_v55 = vpop.f32.mrf.mxu1 }
 0x2aa   :  { %709 = vst.msk [vmem:[#allocation2] sm:$0xff] %vm337_vm9, %v705_v52  ;;  %v708_v58 = vadd.f32 %v702_v53, %v892_v1  ;;  %v694_v9 = vadd.f32 %v737_v63, %v693_v55 }
 0x2ac   :  { %712 = vst.msk [vmem:[#allocation2 + $0x18] sm:$0xff] %vm337_vm9, %v708_v58  ;;  %v706_v0 = vadd.f32 %v694_v9, %v1003_v62 }
 0x2ae   :  { %710 = vst.msk [vmem:[#allocation2 + $0x8] sm:$0xff] %vm337_vm9, %v706_v0 }
 0x2af   :  { %819 = shalt.err (!%p816_p4)
}
 0x2b0   :  { %s832_s14 = smov 128   ;;  %s833_s15 = smov 8  }
 0x2b1   :  { %724 = dma.vmem_to_hbm [thread:$0]  %s719_s13, 512, %s1223_s9, [#allocation3], %s832_s14, %s832_s14, %s833_s15  }
 0x2b2   :  { %828 = dma.done.wait [#allocation3], 512  }
 0x2b3   :  { %829 = vsyncadd [#allocation3], 4294966784 }
 0x2b4   :  { %728 = vsyncpa [#allocation3], 1 }

</bundles_post_ra>
